<compile_context>
chip_gen: v7x
topology: tpu7x:2x2x1
jax: 0.10.0
libtpu: 0.0.40
codegen_flags: <defaults>
</compile_context>

<pallas_src>
import math

import jax
import jax.numpy as jnp
import numpy as np
from jax import lax
from jax.experimental import pallas as pl
from jax.experimental.pallas import tpu as pltpu

_BN_EPS = 1e-5


def _gelu_exact(x):
    # F.gelu default: 0.5 * x * (1 + erf(x / sqrt(2)))
    return 0.5 * x * (1.0 + lax.erf(x * np.float32(1.0 / math.sqrt(2.0))))


# --------------------------------- kernel ---------------------------------- #
def _make_kernel(*, k, dils, ksize, t_blk, T, approx_gelu):
    d0, d1, d2 = dils
    half = (ksize - 1) // 2
    off1 = half * (d1 + d2)              # h0 slab starts at global t0 - off1
    off2 = half * d2                     # h1 slab starts at global t0 - off2
    w1_in = t_blk + 2 * off1
    w2_in = t_blk + 2 * off2

    if approx_gelu:
        gelu = lambda x: jax.nn.gelu(x, approximate=True)   # tanh -> EUP slot
    else:
        gelu = _gelu_exact                                   # matches PyTorch

    def fused_conv(x_f32, w_ref, dil, out_w):
        """Dilated 'same' Conv1d on a halo'd (C, W_in) slab as ONE MXU matmul.

        ksize taps are static lane-slices stacked along sublanes
        (K = ksize*C_in) against the pre-fused (C_out, ksize*C_in) bf16
        weight.  bf16 operands, f32 accumulation."""
        taps = [x_f32[:, j * dil: j * dil + out_w] for j in range(ksize)]
        stacked = jnp.concatenate(taps, axis=0).astype(jnp.bfloat16)
        return jnp.dot(w_ref[...], stacked, preferred_element_type=jnp.float32)

    def boundary_mask(h, width, off):
        # Zero slab columns outside the original [0, T) time range so the next
        # conv sees exactly nn.Conv1d's 'same' zero padding of this tensor.
        g = (pl.program_id(1) * t_blk - off) + lax.broadcasted_iota(
            jnp.int32, (1, width), 1)
        return jnp.where((g >= 0) & (g < T), h, 0.0)

    def kernel(x_ref,
               w0_ref, s0_ref, o0_ref,
               w1_ref, s1_ref, o1_ref,
               w2_ref, b2_ref,
               out_ref):
        x = x_ref[0, 0]                               # (C_pad, t_blk + 2*halo)

        # conv0 (bias folded into o0) [+ residual] -> BN(eval) -> GELU
        h = fused_conv(x, w0_ref, d0, w1_in)
        if k != 0:
            nch = h.shape[0]
            h = h + x[:nch, half * d0: half * d0 + w1_in]
        h = gelu(h * s0_ref[...] + o0_ref[...])
        h = boundary_mask(h, w1_in, off1)

        # conv1 (bias folded into o1) + residual -> BN(eval) -> GELU
        h = fused_conv(h, w1_ref, d1, w2_in) + h[:, half * d1: half * d1 + w2_in]
        h = gelu(h * s1_ref[...] + o1_ref[...])
        h = boundary_mask(h, w2_in, off2)

        # conv2: both GLU halves in ONE matmul, split by static sublane slice
        y = fused_conv(h, w2_ref, d2, t_blk) + b2_ref[...]
        nch = y.shape[0] // 2
        lin, gate = y[:nch], y[nch:]
        # TODO(synk): nn.Dropout in training mode needs RNG masking + 1/(1-p)
        # rescale; this kernel implements inference (dropout == identity).
        out_ref[0] = (lin * jax.nn.sigmoid(gate)).astype(out_ref.dtype)

    return kernel


# ------------------------------ pallas wrapper ------------------------------ #
def conv_block_forward(x, params, *, k, ksize=3, t_blk=512,
                       approx_gelu=False, out_dtype=None):
    """x: (B, C_in, T) f32; params in PyTorch layout; returns (B, D2, T).

    t_blk: time-tile width (multiple of 128); sweep 256/512/1024 in production.
    """
    (w0, b0, g0, be0, m0, v0,
     w1, b1, g1, be1, m1, v1, w2, b2) = params

    B, C_in, T = x.shape
    D2 = w0.shape[0]
    d0 = 2 ** ((2 * k) % 5)
    d1 = 2 ** ((2 * k + 1) % 5)
    d2 = 2
    out_dtype = x.dtype if out_dtype is None else out_dtype

    assert ksize % 2 == 1 and ksize >= 3, "odd ksize expected ('same' padding)"
    assert t_blk % 128 == 0, "keep output stores lane-dense"
    if k != 0:
        assert C_in == D2, "residual conv0(x) + x requires C_in == D2"

    half = (ksize - 1) // 2
    halo = half * (d0 + d1 + d2)        # receptive-field radius of the block

    # ---- pad input channels to a multiple of 16 (bf16 sublane packing); the
    #      zero channels contribute nothing to conv0.
    C_pad = -(-C_in // 16) * 16
    if C_pad != C_in:
        x = jnp.pad(x, ((0, 0), (0, C_pad - C_in), (0, 0)))
        w0 = jnp.pad(w0, ((0, 0), (0, C_pad - C_in), (0, 0)))

    # ---- fold BN (eval) + conv bias into per-channel scale/offset; fuse taps
    def fold_bn_bias(gamma, beta, mean, var, bias):
        s = gamma / jnp.sqrt(var + _BN_EPS)
        o = beta - mean * s + s * bias          # conv bias folded into offset
        return (s.reshape(-1, 1).astype(jnp.float32),
                o.reshape(-1, 1).astype(jnp.float32))

    def fuse_w(w):          # (C_out, C_in, ksize) -> (C_out, ksize*C_in) bf16
        return (jnp.transpose(w, (0, 2, 1))
                .reshape(w.shape[0], -1).astype(jnp.bfloat16))

    s0, o0 = fold_bn_bias(g0, be0, m0, v0, b0)
    s1, o1 = fold_bn_bias(g1, be1, m1, v1, b1)
    flat_params = (fuse_w(w0), s0, o0,
                   fuse_w(w1), s1, o1,
                   fuse_w(w2), b2.reshape(-1, 1).astype(jnp.float32))

    # ---- single overlapping-window input: (B, n_t, C_pad, t_blk + 2*halo)
    n_t = pl.cdiv(T, t_blk)
    T_round = n_t * t_blk
    w_full = t_blk + 2 * halo
    xp = jnp.pad(x, ((0, 0), (0, 0), (halo, halo + T_round - T)))
    xw = jnp.stack([xp[:, :, t * t_blk: t * t_blk + w_full] for t in range(n_t)],
                   axis=1)
    # TODO(synk): a pl.Element overlapping-window BlockSpec directly on xp
    # would avoid this one extra HBM copy of x; kept wrapper-side for robustness.

    # ---- VMEM budget: double-buffered blocks + params + live intermediates
    w1_in = t_blk + 2 * half * (d1 + d2)
    w2_in = t_blk + 2 * half * d2
    out_itemsize = np.dtype(out_dtype).itemsize
    bytes_params = sum(int(a.size) * a.dtype.itemsize for a in flat_params)
    live = (C_pad * w_full * 4                          # input slab (f32)
            + ksize * C_pad * w1_in * 2                 # conv0 stacked RHS (bf16)
            + D2 * w1_in * 4                            # h0 (f32)
            + ksize * D2 * w2_in * 2                    # conv1 stacked RHS
            + D2 * w2_in * 4                            # h1 (f32)
            + ksize * D2 * t_blk * 2                    # conv2 stacked RHS
            + 3 * D2 * t_blk * 4)                       # (lin|gate) + result
    pipe = (2 * (C_pad * w_full * x.dtype.itemsize + D2 * t_blk * out_itemsize)
            + 2 * bytes_params)
    est = pipe + 2 * live
    vmem_limit = int(min(max(est, 32 << 20), 48 << 20))   # 48 MiB: v7x-safe cap

    kernel = _make_kernel(k=k, dils=(d0, d1, d2), ksize=ksize, t_blk=t_blk,
                          T=T, approx_gelu=approx_gelu)

    def param_spec(a):
        zeros = (0,) * a.ndim
        return pl.BlockSpec(a.shape, lambda b, t: zeros)

    out = pl.pallas_call(
        kernel,
        out_shape=jax.ShapeDtypeStruct((B, D2, T_round), out_dtype),
        grid=(B, n_t),
        in_specs=[pl.BlockSpec((1, 1, C_pad, w_full), lambda b, t: (b, t, 0, 0))]
                 + [param_spec(a) for a in flat_params],
        out_specs=pl.BlockSpec((1, D2, t_blk), lambda b, t: (b, 0, t)),
        compiler_params=pltpu.CompilerParams(
            dimension_semantics=("parallel", "parallel"),
            vmem_limit_bytes=vmem_limit),
    )(xw, *flat_params)
    return out[:, :, :T]


# ------------------------- deterministic param init ------------------------- #
def init_params(key, k, D1, D2, ksize=3):
    """PyTorch-layout params: conv (C_out, C_in, ksize) + (C_out,) bias, BN
    gamma/beta/running_mean/running_var per layer."""
    in_ch = D1 if k == 0 else D2
    keys = jax.random.split(key, 14)

    def conv_w(kk, cout, cin):
        lim = 1.0 / math.sqrt(cin * ksize)
        return jax.random.uniform(kk, (cout, cin, ksize), jnp.float32, -lim, lim)

    def conv_b(kk, cout, cin):
        lim = 1.0 / math.sqrt(cin * ksize)
        return jax.random.uniform(kk, (cout,), jnp.float32, -lim, lim)

    def bn(kg, kb, km, kv, c):
        gamma = 1.0 + 0.1 * jax.random.normal(kg, (c,), jnp.float32)
        beta = 0.1 * jax.random.normal(kb, (c,), jnp.float32)
        mean = 0.1 * jax.random.normal(km, (c,), jnp.float32)
        var = jnp.abs(jax.random.normal(kv, (c,), jnp.float32)) + 0.5
        return gamma, beta, mean, var

    w0, b0 = conv_w(keys[0], D2, in_ch), conv_b(keys[1], D2, in_ch)
    g0, be0, m0, v0 = bn(keys[2], keys[3], keys[4], keys[5], D2)
    w1, b1 = conv_w(keys[6], D2, D2), conv_b(keys[7], D2, D2)
    g1, be1, m1, v1 = bn(keys[8], keys[9], keys[10], keys[11], D2)
    w2, b2 = conv_w(keys[12], 2 * D2, D2), conv_b(keys[13], 2 * D2, D2)
    return (w0, b0, g0, be0, m0, v0, w1, b1, g1, be1, m1, v1, w2, b2)


# ----------------------------- pure-JAX reference ---------------------------- #
def conv_block_ref(x, params, *, k, ksize=3):
    (w0, b0, g0, be0, m0, v0,
     w1, b1, g1, be1, m1, v1, w2, b2) = params
    d0 = 2 ** ((2 * k) % 5)
    d1 = 2 ** ((2 * k + 1) % 5)
    d2 = 2

    def conv(h, w, b, d):
        pad = d * (ksize - 1) // 2
        y = lax.conv_general_dilated(
            h, w, window_strides=(1,), padding=[(pad, pad)],
            rhs_dilation=(d,), dimension_numbers=("NCH", "OIH", "NCH"))
        return y + b[None, :, None]

    def bnorm(h, g, be, m, v):
        return ((h - m[None, :, None]) / jnp.sqrt(v[None, :, None] + _BN_EPS)
                * g[None, :, None] + be[None, :, None])

    h = conv(x, w0, b0, d0)
    if k != 0:
        h = h + x
    h = _gelu_exact(bnorm(h, g0, be0, m0, v0))
    h = conv(h, w1, b1, d1) + h
    h = _gelu_exact(bnorm(h, g1, be1, m1, v1))
    h = conv(h, w2, b2, d2)
    D2 = h.shape[1] // 2
    return h[:, :D2] * jax.nn.sigmoid(h[:, D2:])


# ------------------------------------ main ----------------------------------- #
if __name__ == "__main__":
    key = jax.random.PRNGKey(0)
    k0x, k0p, k1x, k1p = jax.random.split(key, 4)

    # case 1: k = 0 (no input residual), 2 time tiles -> exercises interior
    # halos AND left/right array-boundary masking.
    k = 0
    B, D1, D2, T = 2, 16, 32, 256
    x = jax.random.normal(k0x, (B, D1, T), dtype=jnp.float32)
    params = init_params(k0p, k, D1, D2)
    out = jax.block_until_ready(conv_block_forward(x, params, k=k, t_blk=128))
    ref = conv_block_ref(x, params, k=k)
    np.testing.assert_allclose(np.asarray(out), np.asarray(ref),
                               rtol=2e-2, atol=2e-2)
    assert out.shape == (B, D2, T) and out.dtype == jnp.float32

    # case 2: k = 1 (residual path, larger dilations), ragged T (padded tile)
    k = 1
    B, D2, T = 2, 32, 200
    x1 = jax.random.normal(k1x, (B, D2, T), dtype=jnp.float32)
    params1 = init_params(k1p, k, D2, D2)
    out1 = jax.block_until_ready(conv_block_forward(x1, params1, k=k, t_blk=128))
    ref1 = conv_block_ref(x1, params1, k=k)
    np.testing.assert_allclose(np.asarray(out1), np.asarray(ref1),
                               rtol=2e-2, atol=2e-2)
    assert out1.shape == (B, D2, T) and out1.dtype == jnp.float32

    print("KERNEL_OK")
</pallas_src>

<mosaic_0001>
module attributes {stable_mosaic.version = 11 : i64} {
  func.func @kernel(%arg0: i32, %arg1: i32, %arg2: memref<1x1x16x138xf32, #tpu.memory_space<vmem>>, %arg3: memref<32x48xbf16, #tpu.memory_space<vmem>>, %arg4: memref<32x1xf32, #tpu.memory_space<vmem>>, %arg5: memref<32x1xf32, #tpu.memory_space<vmem>>, %arg6: memref<32x96xbf16, #tpu.memory_space<vmem>>, %arg7: memref<32x1xf32, #tpu.memory_space<vmem>>, %arg8: memref<32x1xf32, #tpu.memory_space<vmem>>, %arg9: memref<64x96xbf16, #tpu.memory_space<vmem>>, %arg10: memref<64x1xf32, #tpu.memory_space<vmem>>, %arg11: memref<1x32x128xf32, #tpu.memory_space<vmem>>) attributes {dimension_semantics = [#tpu.dimension_semantics<parallel>, #tpu.dimension_semantics<parallel>], iteration_bounds = array<i64: 2, 2>, scalar_prefetch = 0 : i64, scratch_operands = 0 : i64, tpu.core_type = #tpu.core_type<tc>, window_params = [{transform_indices = @transform_0, window_bounds = array<i64: 1, 1, 16, 138>}, {pipeline_mode = #tpu.pipeline_mode<synchronous>, transform_indices = @transform_1, window_bounds = array<i64: 32, 48>}, {pipeline_mode = #tpu.pipeline_mode<synchronous>, transform_indices = @transform_2, window_bounds = array<i64: 32, 1>}, {pipeline_mode = #tpu.pipeline_mode<synchronous>, transform_indices = @transform_3, window_bounds = array<i64: 32, 1>}, {pipeline_mode = #tpu.pipeline_mode<synchronous>, transform_indices = @transform_4, window_bounds = array<i64: 32, 96>}, {pipeline_mode = #tpu.pipeline_mode<synchronous>, transform_indices = @transform_5, window_bounds = array<i64: 32, 1>}, {pipeline_mode = #tpu.pipeline_mode<synchronous>, transform_indices = @transform_6, window_bounds = array<i64: 32, 1>}, {pipeline_mode = #tpu.pipeline_mode<synchronous>, transform_indices = @transform_7, window_bounds = array<i64: 64, 96>}, {pipeline_mode = #tpu.pipeline_mode<synchronous>, transform_indices = @transform_8, window_bounds = array<i64: 64, 1>}, {transform_indices = @transform_9, window_bounds = array<i64: 1, 32, 128>}]} {
    %c0 = arith.constant 0 : index
    %c0_0 = arith.constant 0 : index
    %c0_1 = arith.constant 0 : index
    %c0_2 = arith.constant 0 : index
    %0 = vector.load %arg2[%c0, %c0_0, %c0_1, %c0_2] : memref<1x1x16x138xf32, #tpu.memory_space<vmem>>, vector<1x1x16x138xf32>
    %1 = vector.shape_cast %0 : vector<1x1x16x138xf32> to vector<16x138xf32>
    %2 = vector.extract_strided_slice %1 {offsets = [0, 0], sizes = [16, 136], strides = [1, 1]} : vector<16x138xf32> to vector<16x136xf32>
    %3 = vector.extract_strided_slice %1 {offsets = [0, 1], sizes = [16, 136], strides = [1, 1]} : vector<16x138xf32> to vector<16x136xf32>
    %4 = vector.extract_strided_slice %1 {offsets = [0, 2], sizes = [16, 136], strides = [1, 1]} : vector<16x138xf32> to vector<16x136xf32>
    %5 = tpu.concatenate %2, %3, %4 in 0 : vector<16x136xf32>, vector<16x136xf32>, vector<16x136xf32> -> vector<48x136xf32>
    %6 = arith.truncf %5 : vector<48x136xf32> to vector<48x136xbf16>
    %c0_3 = arith.constant 0 : index
    %c0_4 = arith.constant 0 : index
    %7 = vector.load %arg3[%c0_3, %c0_4] : memref<32x48xbf16, #tpu.memory_space<vmem>>, vector<32x48xbf16>
    %cst = arith.constant dense<0.000000e+00> : vector<32x136xf32>
    %8 = tpu.matmul %7, %6, %cst {dimension_numbers = #tpu.dot_dimension_numbers<[1], [0], [0], [1], [0, 0, 1, 1], [], []>} : vector<32x48xbf16>, vector<48x136xbf16>, vector<32x136xf32> -> vector<32x136xf32>
    %c0_5 = arith.constant 0 : index
    %c0_6 = arith.constant 0 : index
    %9 = vector.load %arg4[%c0_5, %c0_6] : memref<32x1xf32, #tpu.memory_space<vmem>>, vector<32x1xf32>
    %10 = vector.broadcast %9 : vector<32x1xf32> to vector<32x136xf32>
    %11 = arith.mulf %8, %10 : vector<32x136xf32>
    %c0_7 = arith.constant 0 : index
    %c0_8 = arith.constant 0 : index
    %12 = vector.load %arg5[%c0_7, %c0_8] : memref<32x1xf32, #tpu.memory_space<vmem>>, vector<32x1xf32>
    %13 = vector.broadcast %12 : vector<32x1xf32> to vector<32x136xf32>
    %14 = arith.addf %11, %13 : vector<32x136xf32>
    %cst_9 = arith.constant 5.000000e-01 : f32
    %15 = vector.broadcast %cst_9 : f32 to vector<32x136xf32>
    %16 = arith.mulf %15, %14 : vector<32x136xf32>
    %cst_10 = arith.constant 0.707106769 : f32
    %17 = vector.broadcast %cst_10 : f32 to vector<32x136xf32>
    %18 = arith.mulf %14, %17 : vector<32x136xf32>
    %19 = math.erf %18 : vector<32x136xf32>
    %cst_11 = arith.constant 1.000000e+00 : f32
    %20 = vector.broadcast %cst_11 : f32 to vector<32x136xf32>
    %21 = arith.addf %20, %19 : vector<32x136xf32>
    %22 = arith.mulf %16, %21 : vector<32x136xf32>
    %c128_i32 = arith.constant 128 : i32
    %23 = arith.muli %arg1, %c128_i32 : i32
    %c4_i32 = arith.constant 4 : i32
    %24 = arith.subi %23, %c4_i32 : i32
    %25 = tpu.iota {dimensions = array<i32: 1>} : vector<1x136xi32>
    %26 = vector.broadcast %24 : i32 to vector<1x136xi32>
    %27 = arith.addi %26, %25 : vector<1x136xi32>
    %c0_i32 = arith.constant 0 : i32
    %28 = vector.broadcast %c0_i32 : i32 to vector<1x136xi32>
    %29 = arith.cmpi sge, %27, %28 : vector<1x136xi32>
    %c256_i32 = arith.constant 256 : i32
    %30 = vector.broadcast %c256_i32 : i32 to vector<1x136xi32>
    %31 = arith.cmpi slt, %27, %30 : vector<1x136xi32>
    %32 = arith.andi %29, %31 : vector<1x136xi1>
    %cst_12 = arith.constant 0.000000e+00 : f32
    %33 = vector.shape_cast %32 : vector<1x136xi1> to vector<1x136xi1>
    %34 = vector.broadcast %33 : vector<1x136xi1> to vector<32x136xi1>
    %35 = vector.broadcast %cst_12 : f32 to vector<32x136xf32>
    %36 = arith.select %34, %22, %35 : vector<32x136xi1>, vector<32x136xf32>
    %37 = vector.extract_strided_slice %36 {offsets = [0, 0], sizes = [32, 132], strides = [1, 1]} : vector<32x136xf32> to vector<32x132xf32>
    %38 = vector.extract_strided_slice %36 {offsets = [0, 2], sizes = [32, 132], strides = [1, 1]} : vector<32x136xf32> to vector<32x132xf32>
    %39 = vector.extract_strided_slice %36 {offsets = [0, 4], sizes = [32, 132], strides = [1, 1]} : vector<32x136xf32> to vector<32x132xf32>
    %40 = tpu.concatenate %37, %38, %39 in 0 : vector<32x132xf32>, vector<32x132xf32>, vector<32x132xf32> -> vector<96x132xf32>
    %41 = arith.truncf %40 : vector<96x132xf32> to vector<96x132xbf16>
    %c0_13 = arith.constant 0 : index
    %c0_14 = arith.constant 0 : index
    %42 = vector.load %arg6[%c0_13, %c0_14] : memref<32x96xbf16, #tpu.memory_space<vmem>>, vector<32x96xbf16>
    %cst_15 = arith.constant dense<0.000000e+00> : vector<32x132xf32>
    %43 = tpu.matmul %42, %41, %cst_15 {dimension_numbers = #tpu.dot_dimension_numbers<[1], [0], [0], [1], [0, 0, 1, 1], [], []>} : vector<32x96xbf16>, vector<96x132xbf16>, vector<32x132xf32> -> vector<32x132xf32>
    %44 = vector.extract_strided_slice %36 {offsets = [0, 2], sizes = [32, 132], strides = [1, 1]} : vector<32x136xf32> to vector<32x132xf32>
    %45 = arith.addf %43, %44 : vector<32x132xf32>
    %c0_16 = arith.constant 0 : index
    %c0_17 = arith.constant 0 : index
    %46 = vector.load %arg7[%c0_16, %c0_17] : memref<32x1xf32, #tpu.memory_space<vmem>>, vector<32x1xf32>
    %47 = vector.broadcast %46 : vector<32x1xf32> to vector<32x132xf32>
    %48 = arith.mulf %45, %47 : vector<32x132xf32>
    %c0_18 = arith.constant 0 : index
    %c0_19 = arith.constant 0 : index
    %49 = vector.load %arg8[%c0_18, %c0_19] : memref<32x1xf32, #tpu.memory_space<vmem>>, vector<32x1xf32>
    %50 = vector.broadcast %49 : vector<32x1xf32> to vector<32x132xf32>
    %51 = arith.addf %48, %50 : vector<32x132xf32>
    %cst_20 = arith.constant 5.000000e-01 : f32
    %52 = vector.broadcast %cst_20 : f32 to vector<32x132xf32>
    %53 = arith.mulf %52, %51 : vector<32x132xf32>
    %cst_21 = arith.constant 0.707106769 : f32
    %54 = vector.broadcast %cst_21 : f32 to vector<32x132xf32>
    %55 = arith.mulf %51, %54 : vector<32x132xf32>
    %56 = math.erf %55 : vector<32x132xf32>
    %cst_22 = arith.constant 1.000000e+00 : f32
    %57 = vector.broadcast %cst_22 : f32 to vector<32x132xf32>
    %58 = arith.addf %57, %56 : vector<32x132xf32>
    %59 = arith.mulf %53, %58 : vector<32x132xf32>
    %c128_i32_23 = arith.constant 128 : i32
    %60 = arith.muli %arg1, %c128_i32_23 : i32
    %c2_i32 = arith.constant 2 : i32
    %61 = arith.subi %60, %c2_i32 : i32
    %62 = tpu.iota {dimensions = array<i32: 1>} : vector<1x132xi32>
    %63 = vector.broadcast %61 : i32 to vector<1x132xi32>
    %64 = arith.addi %63, %62 : vector<1x132xi32>
    %c0_i32_24 = arith.constant 0 : i32
    %65 = vector.broadcast %c0_i32_24 : i32 to vector<1x132xi32>
    %66 = arith.cmpi sge, %64, %65 : vector<1x132xi32>
    %c256_i32_25 = arith.constant 256 : i32
    %67 = vector.broadcast %c256_i32_25 : i32 to vector<1x132xi32>
    %68 = arith.cmpi slt, %64, %67 : vector<1x132xi32>
    %69 = arith.andi %66, %68 : vector<1x132xi1>
    %cst_26 = arith.constant 0.000000e+00 : f32
    %70 = vector.shape_cast %69 : vector<1x132xi1> to vector<1x132xi1>
    %71 = vector.broadcast %70 : vector<1x132xi1> to vector<32x132xi1>
    %72 = vector.broadcast %cst_26 : f32 to vector<32x132xf32>
    %73 = arith.select %71, %59, %72 : vector<32x132xi1>, vector<32x132xf32>
    %74 = vector.extract_strided_slice %73 {offsets = [0, 0], sizes = [32, 128], strides = [1, 1]} : vector<32x132xf32> to vector<32x128xf32>
    %75 = vector.extract_strided_slice %73 {offsets = [0, 2], sizes = [32, 128], strides = [1, 1]} : vector<32x132xf32> to vector<32x128xf32>
    %76 = vector.extract_strided_slice %73 {offsets = [0, 4], sizes = [32, 128], strides = [1, 1]} : vector<32x132xf32> to vector<32x128xf32>
    %77 = tpu.concatenate %74, %75, %76 in 0 : vector<32x128xf32>, vector<32x128xf32>, vector<32x128xf32> -> vector<96x128xf32>
    %78 = arith.truncf %77 : vector<96x128xf32> to vector<96x128xbf16>
    %c0_27 = arith.constant 0 : index
    %c0_28 = arith.constant 0 : index
    %79 = vector.load %arg9[%c0_27, %c0_28] : memref<64x96xbf16, #tpu.memory_space<vmem>>, vector<64x96xbf16>
    %cst_29 = arith.constant dense<0.000000e+00> : vector<64x128xf32>
    %80 = tpu.matmul %79, %78, %cst_29 {dimension_numbers = #tpu.dot_dimension_numbers<[1], [0], [0], [1], [0, 0, 1, 1], [], []>} : vector<64x96xbf16>, vector<96x128xbf16>, vector<64x128xf32> -> vector<64x128xf32>
    %c0_30 = arith.constant 0 : index
    %c0_31 = arith.constant 0 : index
    %81 = vector.load %arg10[%c0_30, %c0_31] : memref<64x1xf32, #tpu.memory_space<vmem>>, vector<64x1xf32>
    %82 = vector.broadcast %81 : vector<64x1xf32> to vector<64x128xf32>
    %83 = arith.addf %80, %82 : vector<64x128xf32>
    %84 = vector.extract_strided_slice %83 {offsets = [0, 0], sizes = [32, 128], strides = [1, 1]} : vector<64x128xf32> to vector<32x128xf32>
    %85 = vector.extract_strided_slice %83 {offsets = [32, 0], sizes = [32, 128], strides = [1, 1]} : vector<64x128xf32> to vector<32x128xf32>
    %86 = arith.negf %85 : vector<32x128xf32>
    %87 = math.exp %86 : vector<32x128xf32>
    %cst_32 = arith.constant 1.000000e+00 : f32
    %88 = vector.broadcast %cst_32 : f32 to vector<32x128xf32>
    %89 = arith.addf %88, %87 : vector<32x128xf32>
    %90 = arith.divf %88, %89 : vector<32x128xf32>
    %91 = arith.mulf %84, %90 : vector<32x128xf32>
    %c0_33 = arith.constant 0 : index
    %c0_34 = arith.constant 0 : index
    %c0_35 = arith.constant 0 : index
    %92 = vector.load %arg11[%c0_33, %c0_34, %c0_35] : memref<1x32x128xf32, #tpu.memory_space<vmem>>, vector<1x32x128xf32>
    %93 = vector.shape_cast %92 : vector<1x32x128xf32> to vector<32x128xf32>
    %94 = vector.shape_cast %91 : vector<32x128xf32> to vector<1x32x128xf32>
    tpu.vector_store %arg11[%c0_33, %c0_34, %c0_35], %94 {strides = array<i32>} : memref<1x32x128xf32, #tpu.memory_space<vmem>>, vector<1x32x128xf32>,
    return
  }
  func.func @transform_0(%arg0: i32, %arg1: i32) -> (i32, i32, i32, i32) {
    %c0_i32 = arith.constant 0 : i32
    %c0_i32_0 = arith.constant 0 : i32
    %c0_i32_1 = arith.constant 0 : i32
    return %arg0, %arg1, %c0_i32, %c0_i32_0 : i32, i32, i32, i32
  }
  func.func @transform_1(%arg0: i32, %arg1: i32) -> (i32, i32) {
    %c0_i32 = arith.constant 0 : i32
    %c0_i32_0 = arith.constant 0 : i32
    %c0_i32_1 = arith.constant 0 : i32
    return %c0_i32, %c0_i32_0 : i32, i32
  }
  func.func @transform_2(%arg0: i32, %arg1: i32) -> (i32, i32) {
    %c0_i32 = arith.constant 0 : i32
    %c0_i32_0 = arith.constant 0 : i32
    %c0_i32_1 = arith.constant 0 : i32
    return %c0_i32, %c0_i32_0 : i32, i32
  }
  func.func @transform_3(%arg0: i32, %arg1: i32) -> (i32, i32) {
    %c0_i32 = arith.constant 0 : i32
    %c0_i32_0 = arith.constant 0 : i32
    %c0_i32_1 = arith.constant 0 : i32
    return %c0_i32, %c0_i32_0 : i32, i32
  }
  func.func @transform_4(%arg0: i32, %arg1: i32) -> (i32, i32) {
    %c0_i32 = arith.constant 0 : i32
    %c0_i32_0 = arith.constant 0 : i32
    %c0_i32_1 = arith.constant 0 : i32
    return %c0_i32, %c0_i32_0 : i32, i32
  }
  func.func @transform_5(%arg0: i32, %arg1: i32) -> (i32, i32) {
    %c0_i32 = arith.constant 0 : i32
    %c0_i32_0 = arith.constant 0 : i32
    %c0_i32_1 = arith.constant 0 : i32
    return %c0_i32, %c0_i32_0 : i32, i32
  }
  func.func @transform_6(%arg0: i32, %arg1: i32) -> (i32, i32) {
    %c0_i32 = arith.constant 0 : i32
    %c0_i32_0 = arith.constant 0 : i32
    %c0_i32_1 = arith.constant 0 : i32
    return %c0_i32, %c0_i32_0 : i32, i32
  }
  func.func @transform_7(%arg0: i32, %arg1: i32) -> (i32, i32) {
    %c0_i32 = arith.constant 0 : i32
    %c0_i32_0 = arith.constant 0 : i32
    %c0_i32_1 = arith.constant 0 : i32
    return %c0_i32, %c0_i32_0 : i32, i32
  }
  func.func @transform_8(%arg0: i32, %arg1: i32) -> (i32, i32) {
    %c0_i32 = arith.constant 0 : i32
    %c0_i32_0 = arith.constant 0 : i32
    %c0_i32_1 = arith.constant 0 : i32
    return %c0_i32, %c0_i32_0 : i32, i32
  }
  func.func @transform_9(%arg0: i32, %arg1: i32) -> (i32, i32, i32) {
    %c0_i32 = arith.constant 0 : i32
    %c0_i32_0 = arith.constant 0 : i32
    return %arg0, %c0_i32, %arg1 : i32, i32, i32
  }
}

</mosaic_0001>

<bundles_post_ra>
// kernel: tpu_custom_call.1
= control target key start
LH: loop header
LB: loop body
LE: loop exit
PB: predicated region body
PF: predicated region fallthrough
CT: control target
= control target key end

     0   :  { %14 = vsyncpa [#allocation3], 0  ;;  %s2095_s0 = inlined_call_operand.vmem [shape: f32[2,2,16,138], index: 0, kind: input, shape index: {}]   ;;  %s2096_s1 = inlined_call_operand.vmem [shape: bf16[32,48], index: 1, kind: input, shape index: {}]   ;;  %s2097_s2 = inlined_call_operand.vmem [shape: f32[32,1], index: 2, kind: input, shape index: {}]   ;;  %s2098_s3 = inlined_call_operand.vmem [shape: f32[32,1], index: 3, kind: input, shape index: {}]   ;;  %s2099_s4 = inlined_call_operand.vmem [shape: bf16[32,96], index: 4, kind: input, shape index: {}]   ;;  %s2100_s5 = inlined_call_operand.vmem [shape: f32[32,1], index: 5, kind: input, shape index: {}]   ;;  %s2101_s6 = inlined_call_operand.vmem [shape: f32[32,1], index: 6, kind: input, shape index: {}]   ;;  %s2102_s7 = inlined_call_operand.vmem [shape: bf16[64,96], index: 7, kind: input, shape index: {}]   ;;  %s2103_s8 = inlined_call_operand.vmem [shape: f32[64,1], index: 8, kind: input, shape index: {}]   ;;  %s2104_s9 = inlined_call_operand.hbm [shape: f32[2,32,256], index: 9, kind: output, shape index: {}]  }
   0x1   :  { %16 = vsyncpa [#allocation3 + $0x1], 0  ;;  %s1686_s30 = smov 0   ;;  %s1688_s10 = smov 0  }
   0x2   :  { %s1690_s11 = smov 0   ;;  %s1692_s12 = smov 0  }
   0x3   :  { %s1694_s13 = smov 0   ;;  %s1696_s14 = smov 0  }
   0x4   :  { %s1698_s15 = smov 0   ;;  %s1700_s16 = smov 0  }
   0x5 LB: > { %2111 = sst [smem:[#allocation5_spill]] %s1618_s14  ;;  %s1231_s17 = sadd.s32 4294967295, %s1626_s16   ;;  %s1626_s16 = sphi %s1700_s16, %s22_s16   ;;  %s1622_s15 = sphi %s1698_s15, %s2131_s15   ;;  %s1618_s14 = sphi %s1696_s14, %s2130_s14   ;;  %s1614_s13 = sphi %s1694_s13, %s2129_s13   ;;  %s1610_s12 = sphi %s1692_s12, %s2128_s12   ;;  %s1606_s11 = sphi %s1690_s11, %s2134_s11   ;;  %s1602_s10 = sphi %s1688_s10, %s2133_s10   ;;  %s1598_s30 = sphi %s1686_s30, %s2132_s30  }
   0x6   : > { %2112 = sst [smem:[#allocation6_spill]] %s1622_s15  ;;  %s1232_s18 = sadd.s32 4294967294, %s1626_s16  }
   0x7   : > { %s31_s19 = sadd.s32 1, %s1618_s14  ;;  %s34_s20 = sadd.s32 1, %s1622_s15 }
   0x8   : > { %p32_p0 = scmp.ge.s32.totalorder %s31_s19, 2  ;;  %p249_p1 = scmp.ne.s32.totalorder %s1606_s11, %s1602_s10 }
   0x9   : > { %p250_p2 = scmp.eq.s32.totalorder %s1231_s17, 3  ;;  %p255_p5 = scmp.ne.s32.totalorder %s1602_s10, %s1598_s30 }
   0xa   : > { %s2136_s19 = smov (%p32_p0, %s31_s19), 0  ;;  %s2138_s20 = smov (!%p32_p0, %s34_s20), %s1622_s15 }
   0xb   : > { %2113 = sst [smem:[#allocation7_spill]] %s2136_s19  ;;  %s235_s21 = ssub.s32 %s1618_s14, %s2136_s19 }
   0xc   : > { %p1737_p3 = por %p250_p2, %p249_p1  ;;  %p36_p4 = scmp.ge.s32.totalorder %s2138_s20, 2 }
   0xd   : > { %p256_p6 = scmp.eq.s32.totalorder %s1232_s18, 3  ;;  %p1235_p7 = scmp.ge.s32.totalorder %s1626_s16, 1 }
   0xe   : > { %s2140_s20 = smov (%p36_p4, %s2138_s20), 0  ;;  %p310_p9 = scmp.lt.s32.totalorder %s1626_s16, 5 }
   0xf   : > { %2115 = sst [smem:[#allocation8_spill]] %s2140_s20  ;;  %p1746_p8 = por %p256_p6, %p255_p5 }
  0x10   : > { %s234_s24 = ssub.s32 %s1622_s15, %s2140_s20  ;;  %s239_s25 = sadd.s32 1, %s1606_s11 }
  0x11   : > { %s236_s26 = sor.u32 %s235_s21, %s234_s24  ;;  %p311_p10 = pnand %p1235_p7, %p310_p9 }
  0x12   : > { %p237_p11 = scmp.eq.s32.totalorder %s236_s26, 0  ;;  %p350_p12 = scmp.lt.s32.totalorder (!%p311_p10), %s1614_s13, 1  ;;  %v1630_v8 = vmov (!%p311_p10), 0   ;;  %v479_v9 = vld [vmem:[%s2097_s2 + $0x8] sm:$0xff] (!%p311_p10)  ;;  %v478_v10 = vld [vmem:[%s2097_s2] sm:$0xff] (!%p311_p10)  ;;  %v480_v13 = vld [vmem:[%s2097_s2 + $0x10] sm:$0xff] (!%p311_p10)  ;;  %v584_v46 = vlaneseq (!%p311_p10) }
  0x13   : > { %314 = sbr.rel (%p311_p10) target bundleno = 1195 (0x4ab), region = 56  ;;  %p352_p13 = scmp.lt.s32.totalorder (!%p311_p10), %s1610_s12, 1  ;;  %457 = vmatprep.mubr.bf16.mxu0 (!%p311_p10), %v1630_v8  ;;  %1415 = vset.pattern.permute.xlu1 (!%p311_p10), %v1630_v8  ;;  %v510_v11 = vld [vmem:[%s2098_s3] sm:$0xff] (!%p311_p10)  ;;  %v511_v12 = vld [vmem:[%s2098_s3 + $0x8] sm:$0xff] (!%p311_p10)  ;;  %v481_v14 = vld [vmem:[%s2097_s2 + $0x18] sm:$0xff] (!%p311_p10)  ;;  %vm376_vm0 = vcmask (!%p311_p10), 1039360  }
  0x14   : > { %s1755_s27 = scalar_select %p237_p11, %s1606_s11, %s239_s25  }
  0x15   : > { %s1628_s24 = smov (!%p311_p10), 126   ;;  %s1629_s25 = smov (!%p311_p10), 127   ;;  %1414 = vset.pattern.permute.xlu0 (!%p311_p10), %v1630_v8  ;;  %738 = vmatprep.mubr.bf16.mxu1 (!%p311_p10), %v1630_v8  ;;  %v512_v15 = vld [vmem:[%s2098_s3 + $0x10] sm:$0xff] (!%p311_p10)  ;;  %v513_v16 = vld [vmem:[%s2098_s3 + $0x18] sm:$0xff] (!%p311_p10)  ;;  %vm391_vm1 = vcmask (!%p311_p10), 1031168   ;;  %v1476_v37 = vld [vmem:[%s2096_s1] sm:$0xff] (!%p311_p10)  }
  0x16   : > { %vm418_vm2 = vcmask (!%p311_p10), 392192   ;;  %v1477_v38 = vld [vmem:[%s2096_s1 + $0x8] sm:$0xff] (!%p311_p10)   ;;  %v1804_v57 = vand.u32 (!%p311_p10), 127, %v584_v46  ;;  %vm660_vm11 = vcmask (!%p311_p10), 1014784   ;;  %vm699_vm12 = vcmask (!%p311_p10), 785408   ;;  %s2127_s20 = smov (!%p311_p10), 124  }
  0x1a   : > { %s351_s28 = scalar_select %p350_p12, %s1614_s13, 1 }
  0x1b   : > { %s353_s29 = scalar_select %p352_p13, %s1610_s12, 1 }
  0x1c   : > { %s1238_s17 = sshll.u32 %s351_s28, 3 }
  0x1d   : > { %s1237_s18 = sshll.u32 %s353_s29, 2 }
  0x1e   : > { %s356_s19 = sadd.s32 %s1238_s17, %s1237_s18 }
  0x1f   : > { %s1239_s14 = sshll.u32 %s356_s19, 3  ;;  %s347_s19 = sand.u32 1, %s1602_s10  }
  0x20   : > { %s358_s21 = scalar_lea.vmem %s2095_s0, %s1239_s14  ;;  %s2109_s14 = smov 124  }
  0x21   : > { %v360_v0 = vld [vmem:[%s358_s21] sm:$0xff]  ;;  %v361_v1 = vld [vmem:[%s358_s21 + $0x8] sm:$0xff]  ;;  %v362_v2 = vld [vmem:[%s358_s21 + $0x10] sm:$0xff]  ;;  %s1236_s26 = sshll.u32 %s347_s19, 5 }
  0x22   : > { %v1404_v3 = vpack.i.bf16 %v361_v1, %v360_v0  ;;  %v363_v4 = vld [vmem:[%s358_s21 + $0x18] sm:$0xff]  ;;  %v398_v5 = vpack.c.bf16 %v362_v2, %v360_v0  ;;  %s1244_s21 = sshll.u32 %s1610_s12, 7 }
  0x23   : > { %v399_v6 = vpack.c.bf16 %v363_v4, %v361_v1  ;;  %v1409_v7 = vpack.i.bf16 %v363_v4, %v362_v2  ;;  %s1262_s15 = sadd.s32 4294967294, %s1244_s21 }
  0x24   : > { %1405 = vrot.lane.b32.xlu1 %v1404_v3, %s1628_s24  ;;  %1395 = vrot.lane.b32.xlu0 %v1404_v3, %s1629_s25  ;;  %v1809_v3 = vadd.s32 128, %v1804_v57 }
  0x25   : > { %425 = vmatprep.subr.bf16.mxu0 %v399_v6 }
  0x26   : > { %426 = vmatpush1.bf16.msra.mxu0 %v398_v5 }
  0x28   : > { %1410 = vrot.lane.b32.xlu1 %v1409_v7, %s1628_s24  ;;  %1400 = vrot.lane.b32.xlu0 %v1409_v7, %s1629_s25  ;;  %s1245_s25 = sadd.s32 4294967292, %s1244_s21 }
  0x29   : > { %v587_v2 = vstv %s1245_s25 }
  0x2c   : > { %489 = vperm.xlu1 %1415, %v479_v9   ;;  %484 = vperm.xlu0 %1414, %v478_v10  }
  0x30   : > { %516 = vperm.xlu1 %1415, %v510_v11   ;;  %521 = vperm.xlu0 %1414, %v511_v12  }
  0x34   : > { %494 = vperm.xlu1 %1415, %v480_v13   ;;  %499 = vperm.xlu0 %1414, %v481_v14   ;;  %v588_v14 = vadd.s32 %v587_v2, %v1804_v57 }
  0x36   : > { %vm590_vm3 = vcmp.ge.s32.totalorder %v588_v14, 0  ;;  %vm592_vm4 = vcmp.lt.s32.totalorder %v588_v14, 256  ;;  %v792_v14 = vld [vmem:[%s2101_s6 + $0x8] sm:$0xff] }
  0x37   : > { %vm1813_vm7 = vmand %vm590_vm3, %vm592_vm4 }
  0x38   : > { %526 = vperm.xlu1 %1415, %v512_v15   ;;  %531 = vperm.xlu0 %1414, %v513_v16   ;;  %vm1251_vm10 = vmpackc.low %vm1813_vm7, %vm1813_vm7 }
  0x96   : > { %v1406_v17 = vpop.permute.xlu1 %1405  ;;  %v1396_v18 = vpop.permute.xlu0 %1395 }
  0x97   : > { %v1398_v19 = vunpack.i.h.bf16 %v1396_v18  ;;  %v1397_v20 = vunpack.i.l.bf16 %v1396_v18  ;;  %v1408_v21 = vunpack.i.h.bf16 %v1406_v17  ;;  %v1407_v22 = vunpack.i.l.bf16 %v1406_v17 }
  0x98   : > { %v589_v17 = vadd.s32 %v587_v2, %v1809_v3 }
  0x99   : > { %v377_v30 = vsel %vm376_vm0, %v1397_v20, %v1398_v19  ;;  %v392_v34 = vsel %vm391_vm1, %v1407_v22, %v1408_v21 }
  0x9a   : > { %v1411_v23 = vpop.permute.xlu1 %1410  ;;  %v1401_v24 = vpop.permute.xlu0 %1400  ;;  %vm591_vm5 = vcmp.ge.s32.totalorder %v589_v17, 0  ;;  %vm593_vm6 = vcmp.lt.s32.totalorder %v589_v17, 256  ;;  %v793_v17 = vld [vmem:[%s2101_s6 + $0x10] sm:$0xff] }
  0x9b   : > { %v1413_v25 = vunpack.i.h.bf16 %v1411_v23  ;;  %v1412_v26 = vunpack.i.l.bf16 %v1411_v23  ;;  %v1403_v27 = vunpack.i.h.bf16 %v1401_v24  ;;  %v1402_v28 = vunpack.i.l.bf16 %v1401_v24  ;;  %vm1817_vm8 = vmand %vm591_vm5, %vm593_vm6 }
  0x9c   : > { %vm1248_vm9 = vmpackc.low %vm1817_vm8, %vm1817_vm8 }
  0x9d   : > { %v401_v29 = vpack.c.bf16 %v1403_v27, %v1398_v19  ;;  %v378_v31 = vsel %vm376_vm0, %v1402_v28, %v1403_v27  ;;  %v403_v33 = vpack.c.bf16 %v1413_v25, %v1408_v21  ;;  %v393_v35 = vsel %vm391_vm1, %v1412_v26, %v1413_v25 }
  0x9e   : > { %v400_v32 = vpack.c.bf16 %v378_v31, %v377_v30  ;;  %v402_v36 = vpack.c.bf16 %v393_v35, %v392_v34 }
  0x9f   : > { %427 = vmatprep.subr.bf16.mxu0 %v401_v29 }
  0xa0   : > { %428 = vmatpush1.bf16.msra.mxu0 %v400_v32 }
  0xa1   : > { %429 = vmatprep.subr.bf16.mxu0 %v403_v33 }
  0xa4   : > { %430 = vmatpush1.bf16.msra.mxu0 %v402_v36 }
  0xa7   : > { %1242 = vmatmul.mubr.msk.bf16.vlgmr.msra.gmra.mrb[0].mxu0 %vm418_vm2, %v1476_v37 }
  0xa8   : > { %467 = vmatprep.mubr.bf16.mxu0 %v1630_v8 }
  0xab   : > { %v490_v39 = vpop.permute.xlu1 %489  ;;  %v485_v40 = vpop.permute.xlu0 %484 }
  0xaf   : > { %1243 = vmatmul.mubr.msk.bf16.gmra.mrb[4].mxu0 %vm418_vm2, %v1477_v38  ;;  %v517_v41 = vpop.permute.xlu1 %516  ;;  %v522_v42 = vpop.permute.xlu0 %521 }
  0xb3   : > { %v495_v52 = vpop.permute.xlu1 %494  ;;  %v500_v58 = vpop.permute.xlu0 %499 }
  0xb7   : > { %v527_v4 = vpop.permute.xlu1 %526  ;;  %v532_v11 = vpop.permute.xlu0 %531 }
 0x17a   : > { %v459_v43 = vpop.f32.mrb[0].mxu0 }
 0x17b   : > { %v502_v44 = vmul.f32 %v485_v40, %v459_v43  ;;  %v461_v45 = vpop.f32.mrb[1].mxu0 }
 0x17c   : > { %v503_v47 = vmul.f32 %v485_v40, %v461_v45  ;;  %v463_v48 = vpop.f32.mrb[2].mxu0 }
 0x17d   : > { %v534_v49 = vadd.f32 %v517_v41, %v502_v44  ;;  %v504_v50 = vmul.f32 %v490_v39, %v463_v48  ;;  %v465_v51 = vpop.f32.mrb[3].mxu0 }
 0x17e   : > { %v535_v53 = vadd.f32 %v517_v41, %v503_v47  ;;  %v505_v54 = vmul.f32 %v490_v39, %v465_v51 }
 0x17f   : > { %v550_v55 = vmul.f32 0.70710677, %v534_v49  ;;  %v536_v56 = vadd.f32 %v522_v42, %v504_v50  ;;  %v542_v24 = vmul.f32 0.5, %v534_v49 }
 0x180   : > { %v551_v59 = vmul.f32 0.70710677, %v535_v53  ;;  %v537_v60 = vadd.f32 %v522_v42, %v505_v54  ;;  %v543_v27 = vmul.f32 0.5, %v535_v53 }
 0x181   : > { %1484 = verf.f32 %v550_v55  ;;  %v552_v61 = vmul.f32 0.70710677, %v536_v56  ;;  %v544_v31 = vmul.f32 0.5, %v536_v56 }
 0x182   : > { %1486 = verf.f32 %v551_v59  ;;  %v553_v62 = vmul.f32 0.70710677, %v537_v60  ;;  %v469_v63 = vpop.f32.mrb[4].mxu0  ;;  %v545_v35 = vmul.f32 0.5, %v537_v60 }
 0x183   : > { %1488 = verf.f32 %v552_v61  ;;  %v506_v0 = vmul.f32 %v495_v52, %v469_v63  ;;  %v471_v1 = vpop.f32.mrb[5].mxu0 }
 0x184   : > { %1490 = verf.f32 %v553_v62  ;;  %v507_v5 = vmul.f32 %v495_v52, %v471_v1  ;;  %v473_v6 = vpop.f32.mrb[6].mxu0 }
 0x185   : > { %v538_v7 = vadd.f32 %v527_v4, %v506_v0  ;;  %v508_v9 = vmul.f32 %v500_v58, %v473_v6  ;;  %v475_v10 = vpop.f32.mrb[7].mxu0 }
 0x186   : > { %v539_v12 = vadd.f32 %v527_v4, %v507_v5  ;;  %v509_v13 = vmul.f32 %v500_v58, %v475_v10 }
 0x187   : > { %v554_v15 = vmul.f32 0.70710677, %v538_v7  ;;  %v540_v16 = vadd.f32 %v532_v11, %v508_v9  ;;  %v546_v49 = vmul.f32 0.5, %v538_v7 }
 0x188   : > { %v555_v18 = vmul.f32 0.70710677, %v539_v12  ;;  %v541_v19 = vadd.f32 %v532_v11, %v509_v13  ;;  %v547_v53 = vmul.f32 0.5, %v539_v12  ;;  %v759_v11 = vld [vmem:[%s2100_s5] sm:$0xff]  ;;  %v760_v12 = vld [vmem:[%s2100_s5 + $0x8] sm:$0xff] }
 0x189   : > { %1492 = verf.f32 %v554_v15  ;;  %v556_v20 = vmul.f32 0.70710677, %v540_v16  ;;  %v548_v56 = vmul.f32 0.5, %v540_v16  ;;  %v791_v13 = vld [vmem:[%s2101_s6] sm:$0xff]  ;;  %v761_v15 = vld [vmem:[%s2100_s5 + $0x10] sm:$0xff]  ;;  %v762_v16 = vld [vmem:[%s2100_s5 + $0x18] sm:$0xff] }
 0x18a   : > { %1494 = verf.f32 %v555_v18  ;;  %v557_v21 = vmul.f32 0.70710677, %v541_v19  ;;  %v549_v60 = vmul.f32 0.5, %v541_v19  ;;  %v794_v18 = vld [vmem:[%s2101_s6 + $0x18] sm:$0xff] }
 0x18b   : > { %v1485_v22 = vpop.eup %1484  ;;  %1496 = verf.f32 %v556_v20 }
 0x18c   : > { %v1487_v23 = vpop.eup %1486  ;;  %1498 = verf.f32 %v557_v21  ;;  %v566_v25 = vadd.f32 1.0, %v1485_v22 }
 0x18d   : > { %v1489_v26 = vpop.eup %1488  ;;  %v567_v29 = vadd.f32 1.0, %v1487_v23 }
 0x18e   : > { %v1491_v30 = vpop.eup %1490  ;;  %v574_v32 = vmul.f32 %v566_v25, %v542_v24  ;;  %v568_v34 = vadd.f32 1.0, %v1489_v26 }
 0x18f   : > { %v575_v36 = vmul.f32 %v567_v29, %v543_v27  ;;  %v569_v37 = vadd.f32 1.0, %v1491_v30 }
 0x190   : > { %v600_v38 = vsel %vm1813_vm7, %v574_v32, 0.0  ;;  %v576_v39 = vmul.f32 %v568_v34, %v544_v31 }
 0x191   : > { %616 = vrot.lane.b32.xlu1 %v600_v38, %s1628_s24  ;;  %v601_v40 = vsel %vm1817_vm8, %v575_v36, 0.0  ;;  %v577_v41 = vmul.f32 %v569_v37, %v545_v35 }
 0x192   : > { %v1416_v42 = vpack.i.bf16 %v601_v40, %v600_v38  ;;  %618 = vrot.lane.b32.xlu0 %v601_v40, %s1628_s24  ;;  %v602_v43 = vsel %vm1813_vm7, %v576_v39, 0.0  ;;  %v1252_v44 = vpack.c.bf16 %v576_v39, %v574_v32 }
 0x193   : > { %v1493_v45 = vpop.eup %1492  ;;  %v1249_v46 = vpack.c.bf16 %v577_v41, %v575_v36  ;;  %v603_v47 = vsel %vm1817_vm8, %v577_v41, 0.0 }
 0x194   : > { %v1495_v48 = vpop.eup %1494  ;;  %v1421_v50 = vpack.i.bf16 %v603_v47, %v602_v43  ;;  %v570_v51 = vadd.f32 1.0, %v1493_v45 }
 0x195   : > { %v1497_v52 = vpop.eup %1496  ;;  %620 = vrot.lane.b32.xlu1 %v602_v43, %s1628_s24  ;;  %1250 = vmatprep.subr.msk.bf16.mxu1 %vm1248_vm9, %v1249_v46  ;;  %v571_v54 = vadd.f32 1.0, %v1495_v48 }
 0x196   : > { %v1499_v55 = vpop.eup %1498  ;;  %1253 = vmatpush1.bf16.msk.msra.mxu1 %vm1251_vm10, %v1252_v44  ;;  %622 = vrot.lane.b32.xlu0 %v603_v47, %s1628_s24  ;;  %v578_v58 = vmul.f32 %v570_v51, %v546_v49  ;;  %v572_v59 = vadd.f32 1.0, %v1497_v52 }
 0x197   : > { %v573_v61 = vadd.f32 1.0, %v1499_v55  ;;  %v579_v62 = vmul.f32 %v571_v54, %v547_v53  ;;  %v1478_v55 = vld [vmem:[%s2099_s4] sm:$0xff]  }
 0x198   : > { %v604_v63 = vsel %vm1813_vm7, %v578_v58, 0.0  ;;  %v580_v0 = vmul.f32 %v572_v59, %v548_v56  ;;  %v1479_v56 = vld [vmem:[%s2099_s4 + $0x8] sm:$0xff]  }
 0x199   : > { %v581_v1 = vmul.f32 %v573_v61, %v549_v60  ;;  %624 = vrot.lane.b32.xlu1 %v604_v63, %s1628_s24  ;;  %v605_v2 = vsel %vm1817_vm8, %v579_v62, 0.0 }
 0x19a   : > { %v1426_v4 = vpack.i.bf16 %v605_v2, %v604_v63  ;;  %626 = vrot.lane.b32.xlu0 %v605_v2, %s1628_s24  ;;  %v606_v5 = vsel %vm1813_vm7, %v580_v0, 0.0  ;;  %v1258_v6 = vpack.c.bf16 %v580_v0, %v578_v58 }
 0x19b   : > { %v1255_v7 = vpack.c.bf16 %v581_v1, %v579_v62  ;;  %v607_v9 = vsel %vm1817_vm8, %v581_v1, 0.0 }
 0x19c   : > { %v1431_v10 = vpack.i.bf16 %v607_v9, %v606_v5 }
 0x19d   : > { %628 = vrot.lane.b32.xlu1 %v606_v5, %s1628_s24  ;;  %1256 = vmatprep.subr.msk.bf16.mxu1 %vm1248_vm9, %v1255_v7 }
 0x19e   : > { %1259 = vmatpush1.bf16.msk.msra.mxu1 %vm1251_vm10, %v1258_v6  ;;  %630 = vrot.lane.b32.xlu0 %v607_v9, %s1628_s24 }
 0x1a1   : > { %1417 = vrot.lane.b32.xlu1 %v1416_v42, %s2109_s14 }
 0x1a2   : > { %1422 = vrot.lane.b32.xlu0 %v1421_v50, %s2109_s14 }
 0x1a5   : > { %1427 = vrot.lane.b32.xlu1 %v1426_v4, %s2109_s14 }
 0x1a6   : > { %1432 = vrot.lane.b32.xlu0 %v1431_v10, %s2109_s14 }
 0x1a9   : > { %765 = vperm.xlu1 %1415, %v759_v11  }
 0x1aa   : > { %770 = vperm.xlu0 %1414, %v760_v12  }
 0x1ad   : > { %797 = vperm.xlu1 %1415, %v791_v13  }
 0x1ae   : > { %802 = vperm.xlu0 %1414, %v792_v14  }
 0x1b1   : > { %775 = vperm.xlu1 %1415, %v761_v15  }
 0x1b2   : > { %780 = vperm.xlu0 %1414, %v762_v16  }
 0x1b5   : > { %807 = vperm.xlu1 %1415, %v793_v17  }
 0x1b6   : > { %812 = vperm.xlu0 %1414, %v794_v18  }
 0x203   : > { %v617_v19 = vpop.permute.xlu1 %616 }
 0x204   : > { %v619_v20 = vpop.permute.xlu0 %618 }
 0x205   : > { %v632_v23 = vsel %vm391_vm1, %v617_v19, %v619_v20 }
 0x207   : > { %v621_v21 = vpop.permute.xlu1 %620 }
 0x208   : > { %v623_v22 = vpop.permute.xlu0 %622 }
 0x209   : > { %v633_v24 = vsel %vm391_vm1, %v621_v21, %v623_v22  ;;  %v678_v25 = vpack.c.bf16 %v623_v22, %v619_v20 }
 0x20a   : > { %v677_v26 = vpack.c.bf16 %v633_v24, %v632_v23 }
 0x20b   : > { %v625_v27 = vpop.permute.xlu1 %624  ;;  %710 = vmatprep.subr.bf16.mxu1 %v678_v25 }
 0x20c   : > { %v1901_v28 = vpop.permute.xlu0 %626  ;;  %711 = vmatpush1.bf16.msra.mxu1 %v677_v26 }
 0x20d   : > { %v1907_v31 = vsel %vm391_vm1, %v625_v27, %v1901_v28 }
 0x20f   : > { %v629_v29 = vpop.permute.xlu1 %628 }
 0x210   : > { %v1903_v30 = vpop.permute.xlu0 %630 }
 0x211   : > { %v1911_v32 = vsel %vm391_vm1, %v629_v29, %v1903_v30  ;;  %v680_v33 = vpack.c.bf16 %v1903_v30, %v1901_v28 }
 0x212   : > { %v679_v34 = vpack.c.bf16 %v1911_v32, %v1907_v31 }
 0x213   : > { %v1418_v35 = vpop.permute.xlu1 %1417  ;;  %712 = vmatprep.subr.bf16.mxu1 %v680_v33  ;;  %v864_v33 = vstv %s1262_s15  ;;  %s1632_s15 = smov [#allocation2]  }
 0x214   : > { %v1420_v36 = vunpack.i.h.bf16 %v1418_v35  ;;  %v1419_v37 = vunpack.i.l.bf16 %v1418_v35  ;;  %713 = vmatpush1.bf16.msra.mxu1 %v679_v34  ;;  %v1423_v38 = vpop.permute.xlu0 %1422  ;;  %s1536_s21 = sshll.u32 %s1632_s15, 4  ;;  %s1537_s21 = int_to_ptr.vmem [resolvable:$false] %s1536_s21 }
 0x215   : > { %v1425_v39 = vunpack.i.h.bf16 %v1423_v38  ;;  %v1424_v40 = vunpack.i.l.bf16 %v1423_v38 }
 0x216   : > { %v661_v41 = vsel %vm660_vm11, %v1419_v37, %v1420_v36 }
 0x217   : > { %v682_v42 = vpack.c.bf16 %v1425_v39, %v1420_v36  ;;  %v1428_v43 = vpop.permute.xlu1 %1427  ;;  %v662_v44 = vsel %vm660_vm11, %v1424_v40, %v1425_v39 }
 0x218   : > { %v1430_v45 = vunpack.i.h.bf16 %v1428_v43  ;;  %v1429_v46 = vunpack.i.l.bf16 %v1428_v43  ;;  %v1433_v47 = vpop.permute.xlu0 %1432  ;;  %v681_v48 = vpack.c.bf16 %v662_v44, %v661_v41  ;;  %v865_v41 = vadd.s32 %v864_v33, %v1804_v57 }
 0x219   : > { %v1435_v49 = vunpack.i.h.bf16 %v1433_v47  ;;  %v1434_v50 = vunpack.i.l.bf16 %v1433_v47  ;;  %714 = vmatprep.subr.bf16.mxu1 %v682_v42  ;;  %v866_v43 = vadd.s32 %v864_v33, %v1809_v3 }
 0x21a   : > { %715 = vmatpush1.bf16.msra.mxu1 %v681_v48  ;;  %v663_v51 = vsel %vm660_vm11, %v1429_v46, %v1430_v45  ;;  %vm867_vm13 = vcmp.ge.s32.totalorder %v865_v41, 0  ;;  %vm869_vm14 = vcmp.lt.s32.totalorder %v865_v41, 256  ;;  %v957_v41 = vld [vmem:[%s2103_s8 + $0x10] sm:$0xff] }
 0x21b   : > { %v684_v52 = vpack.c.bf16 %v1435_v49, %v1430_v45  ;;  %v664_v53 = vsel %vm660_vm11, %v1434_v50, %v1435_v49  ;;  %vm868_vm15 = vcmp.ge.s32.totalorder %v866_v43, 0  ;;  %vm870_vm0 = vcmp.lt.s32.totalorder %v866_v43, 256  ;;  %vm1938_vm2 = vmand %vm867_vm13, %vm869_vm14 }
 0x21c   : > { %v683_v54 = vpack.c.bf16 %v664_v53, %v663_v51  ;;  %vm1942_vm3 = vmand %vm868_vm15, %vm870_vm0 }
 0x21d   : > { %716 = vmatprep.subr.bf16.mxu1 %v684_v52  ;;  %vm1951_vm4 = vmpackc.low %vm1938_vm2, %vm1938_vm2 }
 0x21e   : > { %717 = vmatpush1.bf16.msra.mxu1 %v683_v54 }
 0x221   : > { %1260 = vmatmul.mubr.msk.bf16.vlgmr.msra.gmra.mrb[0].mxu1 %vm699_vm12, %v1478_v55 }
 0x222   : > { %748 = vmatprep.mubr.bf16.mxu1 %v1630_v8 }
 0x228   : > { %v766_v58 = vpop.permute.xlu1 %765 }
 0x229   : > { %1261 = vmatmul.mubr.msk.bf16.gmra.mrb[4].mxu1 %vm699_vm12, %v1479_v56  ;;  %v771_v59 = vpop.permute.xlu0 %770 }
 0x22c   : > { %v798_v60 = vpop.permute.xlu1 %797 }
 0x22d   : > { %v803_v0 = vpop.permute.xlu0 %802 }
 0x230   : > { %v776_v11 = vpop.permute.xlu1 %775 }
 0x231   : > { %v781_v16 = vpop.permute.xlu0 %780 }
 0x234   : > { %v808_v34 = vpop.permute.xlu1 %807 }
 0x2f4   : > { %v740_v61 = vpop.f32.mrb[0].mxu1 }
 0x2f5   : > { %v741_v62 = vadd.f32 %v740_v61, %v632_v23  ;;  %v742_v63 = vpop.f32.mrb[1].mxu1 }
 0x2f6   : > { %v743_v1 = vadd.f32 %v742_v63, %v619_v20  ;;  %v744_v2 = vpop.f32.mrb[2].mxu1 }
 0x2f7   : > { %v783_v4 = vmul.f32 %v766_v58, %v741_v62  ;;  %v745_v5 = vadd.f32 %v744_v2, %v633_v24  ;;  %v746_v6 = vpop.f32.mrb[3].mxu1 }
 0x2f8   : > { %v784_v8 = vmul.f32 %v766_v58, %v743_v1  ;;  %v747_v7 = vadd.f32 %v746_v6, %v623_v22 }
 0x2f9   : > { %v815_v9 = vadd.f32 %v798_v60, %v783_v4  ;;  %v785_v10 = vmul.f32 %v771_v59, %v745_v5 }
 0x2fa   : > { %v816_v12 = vadd.f32 %v798_v60, %v784_v8  ;;  %v786_v13 = vmul.f32 %v771_v59, %v747_v7 }
 0x2fb   : > { %v831_v14 = vmul.f32 0.70710677, %v815_v9  ;;  %v817_v15 = vadd.f32 %v803_v0, %v785_v10  ;;  %v823_v48 = vmul.f32 0.5, %v815_v9 }
 0x2fc   : > { %v832_v17 = vmul.f32 0.70710677, %v816_v12  ;;  %v818_v18 = vadd.f32 %v803_v0, %v786_v13  ;;  %v750_v19 = vpop.f32.mrb[4].mxu1  ;;  %v824_v50 = vmul.f32 0.5, %v816_v12 }
 0x2fd   : > { %1500 = verf.f32 %v831_v14  ;;  %v833_v20 = vmul.f32 0.70710677, %v817_v15  ;;  %v751_v21 = vadd.f32 %v750_v19, %v1907_v31  ;;  %v752_v23 = vpop.f32.mrb[5].mxu1  ;;  %v813_v31 = vpop.permute.xlu0 %812  ;;  %v825_v54 = vmul.f32 0.5, %v817_v15 }
 0x2fe   : > { %1502 = verf.f32 %v832_v17  ;;  %v834_v22 = vmul.f32 0.70710677, %v818_v18  ;;  %v753_v24 = vadd.f32 %v752_v23, %v1901_v28  ;;  %v754_v25 = vpop.f32.mrb[6].mxu1  ;;  %v826_v58 = vmul.f32 0.5, %v818_v18 }
 0x2ff   : > { %1504 = verf.f32 %v833_v20  ;;  %v787_v26 = vmul.f32 %v776_v11, %v751_v21  ;;  %v755_v27 = vadd.f32 %v754_v25, %v1911_v32  ;;  %v756_v29 = vpop.f32.mrb[7].mxu1 }
 0x300   : > { %1506 = verf.f32 %v834_v22  ;;  %v788_v35 = vmul.f32 %v776_v11, %v753_v24  ;;  %v757_v36 = vadd.f32 %v756_v29, %v1903_v30 }
 0x301   : > { %v819_v37 = vadd.f32 %v808_v34, %v787_v26  ;;  %v789_v38 = vmul.f32 %v781_v16, %v755_v27 }
 0x302   : > { %v820_v39 = vadd.f32 %v808_v34, %v788_v35  ;;  %v790_v40 = vmul.f32 %v781_v16, %v757_v36  ;;  %v1480_v35 = vld [vmem:[%s2102_s7] sm:$0xff]  }
 0x303   : > { %v835_v28 = vmul.f32 0.70710677, %v819_v37  ;;  %v821_v42 = vadd.f32 %v813_v31, %v789_v38  ;;  %v827_v9 = vmul.f32 0.5, %v819_v37  ;;  %1308 = vmatprep.mubr.msk.bf16.mxu0 %vm699_vm12, %v1480_v35  ;;  %v959_v36 = vld [vmem:[%s2103_s8 + $0x20] sm:$0xff]  ;;  %v960_v37 = vld [vmem:[%s2103_s8 + $0x28] sm:$0xff]  ;;  %v961_v38 = vld [vmem:[%s2103_s8 + $0x30] sm:$0xff] }
 0x304   : > { %v836_v44 = vmul.f32 0.70710677, %v820_v39  ;;  %v822_v32 = vadd.f32 %v813_v31, %v790_v40  ;;  %v828_v13 = vmul.f32 0.5, %v820_v39  ;;  %v962_v31 = vld [vmem:[%s2103_s8 + $0x38] sm:$0xff]  ;;  %v955_v39 = vld [vmem:[%s2103_s8] sm:$0xff]  ;;  %v956_v40 = vld [vmem:[%s2103_s8 + $0x8] sm:$0xff] }
 0x305   : > { %1508 = verf.f32 %v835_v28  ;;  %v837_v45 = vmul.f32 0.70710677, %v821_v42  ;;  %v829_v17 = vmul.f32 0.5, %v821_v42  ;;  %v958_v28 = vld [vmem:[%s2103_s8 + $0x18] sm:$0xff] }
 0x306   : > { %1510 = verf.f32 %v836_v44  ;;  %v838_v46 = vmul.f32 0.70710677, %v822_v32  ;;  %v830_v19 = vmul.f32 0.5, %v822_v32 }
 0x307   : > { %v1501_v30 = vpop.eup %1500  ;;  %1512 = verf.f32 %v837_v45 }
 0x308   : > { %v1503_v47 = vpop.eup %1502  ;;  %v847_v49 = vadd.f32 1.0, %v1501_v30  ;;  %1514 = verf.f32 %v838_v46 }
 0x309   : > { %v1505_v57 = vpop.eup %1504  ;;  %v848_v51 = vadd.f32 1.0, %v1503_v47 }
 0x30a   : > { %v1507_v52 = vpop.eup %1506  ;;  %v855_v53 = vmul.f32 %v847_v49, %v823_v48  ;;  %v849_v55 = vadd.f32 1.0, %v1505_v57 }
 0x30b   : > { %v856_v59 = vmul.f32 %v848_v51, %v824_v50  ;;  %v850_v60 = vadd.f32 1.0, %v1507_v52 }
 0x30c   : > { %v857_v61 = vmul.f32 %v849_v55, %v825_v54  ;;  %v877_v62 = vsel %vm1938_vm2, %v855_v53, 0.0 }
 0x30d   : > { %v878_v0 = vsel %vm1942_vm3, %v856_v59, 0.0  ;;  %v858_v1 = vmul.f32 %v850_v60, %v826_v58 }
 0x30e   : > { %v1268_v2 = vpack.c.bf16 %v857_v61, %v855_v53  ;;  %v1436_v4 = vpack.i.bf16 %v878_v0, %v877_v62  ;;  %v879_v5 = vsel %vm1938_vm2, %v857_v61, 0.0 }
 0x30f   : > { %v1509_v6 = vpop.eup %1508  ;;  %v880_v8 = vsel %vm1942_vm3, %v858_v1, 0.0 }
 0x310   : > { %v1511_v7 = vpop.eup %1510  ;;  %v851_v10 = vadd.f32 1.0, %v1509_v6  ;;  %1296 = vmatprep.subr.msk.bf16.mxu0 %vm1951_vm4, %v1268_v2  ;;  %1437 = vrot.lane.b32.xlu1 %v1436_v4, %s1628_s24  ;;  %v1441_v11 = vpack.i.bf16 %v880_v8, %v879_v5 }
 0x311   : > { %v1513_v12 = vpop.eup %1512  ;;  %1297 = vmatpush3.bf16.msk.msra.mxu0 %vm1951_vm4, %v1268_v2  ;;  %v852_v14 = vadd.f32 1.0, %v1511_v7 }
 0x312   : > { %v1515_v15 = vpop.eup %1514  ;;  %v859_v16 = vmul.f32 %v851_v10, %v827_v9  ;;  %v853_v18 = vadd.f32 1.0, %v1513_v12  ;;  %1442 = vrot.lane.b32.xlu0 %v1441_v11, %s1628_s24  ;;  %v1481_v12 = vld [vmem:[%s2102_s7 + $0x8] sm:$0xff]  }
 0x313   : > { %v860_v20 = vmul.f32 %v852_v14, %v828_v13  ;;  %v854_v21 = vadd.f32 1.0, %v1515_v15  ;;  %v1482_v13 = vld [vmem:[%s2102_s7 + $0x10] sm:$0xff]   ;;  %v1483_v14 = vld [vmem:[%s2102_s7 + $0x18] sm:$0xff]  }
 0x314   : > { %v861_v23 = vmul.f32 %v853_v18, %v829_v17  ;;  %v881_v22 = vsel %vm1938_vm2, %v859_v16, 0.0 }
 0x315   : > { %v882_v24 = vsel %vm1942_vm3, %v860_v20, 0.0  ;;  %v862_v25 = vmul.f32 %v854_v21, %v830_v19 }
 0x316   : > { %v1271_v26 = vpack.c.bf16 %v861_v23, %v859_v16  ;;  %v1446_v27 = vpack.i.bf16 %v882_v24, %v881_v22  ;;  %v883_v29 = vsel %vm1938_vm2, %v861_v23, 0.0 }
 0x317   : > { %v884_v33 = vsel %vm1942_vm3, %v862_v25, 0.0 }
 0x318   : > { %1298 = vmatprep.subr.msk.bf16.mxu0 %vm1951_vm4, %v1271_v26  ;;  %1447 = vrot.lane.b32.xlu1 %v1446_v27, %s1628_s24  ;;  %v1456_v34 = vpack.i.bf16 %v884_v33, %v883_v29 }
 0x319   : > { %1299 = vmatpush3.bf16.msk.msra.mxu0 %vm1951_vm4, %v1271_v26 }
 0x31a   : > { %1457 = vrot.lane.b32.xlu0 %v1456_v34, %s1628_s24  ;;  %s349_s24 = scalar_lea.vmem [#allocation2], %s1236_s26 }
 0x31b   : > { %s1147_s14 = sshll.u32 %s349_s24, 4  ;;  %s2041_s14 = int_to_ptr.vmem [resolvable:$true] %s1147_s14 }
 0x31c   : > { %1452 = vrot.lane.b32.xlu1 %v1436_v4, %s2127_s20  ;;  %s1532_s25 = scalar_lea.vmem %s2041_s14, 512  ;;  %p1539_p4 = scmp.lt.s32.totalorder %s2041_s14, %s1537_s21 }
 0x31d   : > { %p1533_p0 = scmp.ne.s32.totalorder %s2041_s14, %s1532_s25 }
 0x31e   : > { %1462 = vrot.lane.b32.xlu0 %v1441_v11, %s2127_s20 }
 0x31f   : > { %p1534_p1 = pnand %p1533_p0, %p1737_p3 }
 0x320   : > { %1467 = vrot.lane.b32.xlu1 %v1446_v27, %s2127_s20 }
 0x321   : > { %p1535_p2 = pneg %p1534_p1 }
 0x322   : > { %1472 = vrot.lane.b32.xlu0 %v1456_v34, %s2127_s20  ;;  %s1282_s20 = sshll.u32 %s1614_s13, 3 }
 0x323   : > { %s1144_s28 = sadd.s32 %s1610_s12, %s1282_s20  ;;  %s2043_s12 = scalar_lea.sflag [#allocation3], %s347_s19 }
 0x324   : > { %985 = vperm.xlu1 %1415, %v959_v36   ;;  %s1283_s29 = sshll.u32 %s1144_s28, 7  ;;  %s1538_s20 = scalar_lea.vmem %s1537_s21, 1024 }
 0x325   : > { %s2039_s18 = scalar_lea.hbm %s2104_s9, %s1283_s29  ;;  %p1540_p5 = scmp.lt.s32.totalorder %s1538_s20, %s1532_s25 }
 0x326   : > { %990 = vperm.xlu0 %1414, %v960_v37  }
 0x327   : > { %p1541_p6 = por %p1540_p5, %p1539_p4 }
 0x328   : > { %995 = vperm.xlu1 %1415, %v961_v38  }
 0x329   : > { %p1542_p7 = pnand %p1541_p6, %p1535_p2 }
 0x32a   : > { %1000 = vperm.xlu0 %1414, %v962_v31  }
 0x32c   : > { %965 = vperm.xlu1 %1415, %v955_v39  }
 0x32e   : > { %970 = vperm.xlu0 %1414, %v956_v40  }
 0x330   : > { %975 = vperm.xlu1 %1415, %v957_v41  }
 0x332   : > { %980 = vperm.xlu0 %1414, %v958_v28  }
 0x382   : > { %v1438_v42 = vpop.permute.xlu1 %1437 }
 0x383   : > { %v1440_v43 = vunpack.i.h.bf16 %v1438_v42  ;;  %v1439_v44 = vunpack.i.l.bf16 %v1438_v42 }
 0x384   : > { %v1443_v32 = vpop.permute.xlu0 %1442 }
 0x385   : > { %v1445_v45 = vunpack.i.h.bf16 %v1443_v32  ;;  %v1444_v46 = vunpack.i.l.bf16 %v1443_v32  ;;  %v909_v30 = vsel %vm391_vm1, %v1439_v44, %v1440_v43 }
 0x387   : > { %v910_v47 = vsel %vm391_vm1, %v1444_v46, %v1445_v45 }
 0x388   : > { %v943_v48 = vpack.c.bf16 %v910_v47, %v909_v30 }
 0x38a   : > { %v1448_v49 = vpop.permute.xlu1 %1447  ;;  %1300 = vmatprep.subr.bf16.mxu0 %v943_v48 }
 0x38b   : > { %v1450_v57 = vunpack.i.h.bf16 %v1448_v49  ;;  %v1449_v50 = vunpack.i.l.bf16 %v1448_v49  ;;  %1301 = vmatpush3.bf16.msra.mxu0 %v943_v48 }
 0x38c   : > { %v1458_v3 = vpop.permute.xlu0 %1457 }
 0x38d   : > { %v1460_v51 = vunpack.i.h.bf16 %v1458_v3  ;;  %v1459_v52 = vunpack.i.l.bf16 %v1458_v3  ;;  %v911_v56 = vsel %vm391_vm1, %v1449_v50, %v1450_v57 }
 0x38e   : > { %v1453_v53 = vpop.permute.xlu1 %1452 }
 0x38f   : > { %v1455_v54 = vunpack.i.h.bf16 %v1453_v53  ;;  %v1454_v55 = vunpack.i.l.bf16 %v1453_v53  ;;  %v912_v58 = vsel %vm391_vm1, %v1459_v52, %v1460_v51 }
 0x390   : > { %v1463_v59 = vpop.permute.xlu0 %1462  ;;  %v944_v60 = vpack.c.bf16 %v912_v58, %v911_v56 }
 0x391   : > { %v1465_v61 = vunpack.i.h.bf16 %v1463_v59  ;;  %v1464_v62 = vunpack.i.l.bf16 %v1463_v59  ;;  %v933_v2 = vsel %vm660_vm11, %v1454_v55, %v1455_v54 }
 0x392   : > { %v1468_v63 = vpop.permute.xlu1 %1467  ;;  %1302 = vmatprep.subr.bf16.mxu0 %v944_v60 }
 0x393   : > { %v1470_v0 = vunpack.i.h.bf16 %v1468_v63  ;;  %v1469_v1 = vunpack.i.l.bf16 %v1468_v63  ;;  %1303 = vmatpush3.bf16.msra.mxu0 %v944_v60  ;;  %v934_v4 = vsel %vm660_vm11, %v1464_v62, %v1465_v61 }
 0x394   : > { %v1473_v5 = vpop.permute.xlu0 %1472  ;;  %v945_v6 = vpack.c.bf16 %v934_v4, %v933_v2 }
 0x395   : > { %v1475_v8 = vunpack.i.h.bf16 %v1473_v5  ;;  %v1474_v7 = vunpack.i.l.bf16 %v1473_v5  ;;  %v935_v9 = vsel %vm660_vm11, %v1469_v1, %v1470_v0 }
 0x396   : > { %1304 = vmatprep.subr.bf16.mxu0 %v945_v6 }
 0x397   : > { %1305 = vmatpush3.bf16.msra.mxu0 %v945_v6  ;;  %v936_v10 = vsel %vm660_vm11, %v1474_v7, %v1475_v8 }
 0x398   : > { %v946_v11 = vpack.c.bf16 %v936_v10, %v935_v9 }
 0x39a   : > { %1306 = vmatprep.subr.bf16.mxu0 %v946_v11 }
 0x39b   : > { %1307 = vmatpush3.bf16.msra.mxu0 %v946_v11 }
 0x39e   : > { %1309 = vmatmul.mubr.msk.bf16.vlgmr.msra.gmra.mrb[8].mxu0 %vm699_vm12, %v1481_v12 }
 0x39f   : > { %1312 = vmatprep.mubr.msk.bf16.mxu0 %vm699_vm12, %v1482_v13 }
 0x3a3   : > { %v986_v17 = vpop.permute.xlu1 %985 }
 0x3a5   : > { %v991_v20 = vpop.permute.xlu0 %990 }
 0x3a6   : > { %1313 = vmatmul.mubr.msk.bf16.gmra.mrb[12].mxu0 %vm699_vm12, %v1483_v14 }
 0x3a7   : > { %v996_v21 = vpop.permute.xlu1 %995 }
 0x3a9   : > { %v1001_v25 = vpop.permute.xlu0 %1000 }
 0x3ab   : > { %v966_v32 = vpop.permute.xlu1 %965 }
 0x3ad   : > { %v971_v45 = vpop.permute.xlu0 %970 }
 0x3af   : > { %v976_v46 = vpop.permute.xlu1 %975 }
 0x3b1   : > { %v981_v48 = vpop.permute.xlu0 %980 }
 0x471   : > { %v1310_v15 = vpop.f32.mrb[8].mxu0 }
 0x472   : > { %v1069_v16 = vpop.f32.mrb[9].mxu0  ;;  %v1078_v30 = vadd.f32 %v1310_v15, %v976_v46 }
 0x473   : > { %v1311_v18 = vpop.f32.mrb[10].mxu0  ;;  %v1070_v49 = vadd.f32 %v1069_v16, %v966_v32 }
 0x474   : > { %v1072_v19 = vpop.f32.mrb[11].mxu0  ;;  %v1081_v50 = vadd.f32 %v1311_v18, %v981_v48 }
 0x475   : > { %v1073_v52 = vadd.f32 %v1072_v19, %v971_v45 }
 0x479   : > { %v1314_v23 = vpop.f32.mrb[12].mxu0 }
 0x47a   : > { %v1094_v22 = vadd.f32 %v1314_v23, %v996_v21  ;;  %v1085_v24 = vpop.f32.mrb[13].mxu0 }
 0x47b   : > { %v1086_v26 = vadd.f32 %v1085_v24, %v986_v17  ;;  %v1315_v27 = vpop.f32.mrb[14].mxu0 }
 0x47c   : > { %v1279_v29 = vmul.f32 -1.442695, %v1094_v22  ;;  %v1097_v33 = vadd.f32 %v1315_v27, %v1001_v25  ;;  %v1088_v34 = vpop.f32.mrb[15].mxu0 }
 0x47d   : > { %v1277_v35 = vmul.f32 -1.442695, %v1086_v26  ;;  %v1089_v36 = vadd.f32 %v1088_v34, %v991_v20 }
 0x47e   : > { %1516 = vpow2.f32 %v1279_v29  ;;  %v1280_v37 = vmul.f32 -1.442695, %v1097_v33 }
 0x47f   : > { %1518 = vpow2.f32 %v1277_v35  ;;  %v1278_v38 = vmul.f32 -1.442695, %v1089_v36 }
 0x480   : > { %1520 = vpow2.f32 %v1280_v37 }
 0x481   : > { %1522 = vpow2.f32 %v1278_v38 }
 0x488   : > { %v1517_v31 = vpop.eup %1516 }
 0x489   : > { %v1519_v39 = vpop.eup %1518  ;;  %v1114_v40 = vadd.f32 1.0, %v1517_v31 }
 0x48a   : > { %v1521_v41 = vpop.eup %1520  ;;  %v1112_v28 = vadd.f32 1.0, %v1519_v39 }
 0x48b   : > { %v1523_v42 = vpop.eup %1522  ;;  %1524 = vrcp.f32 %v1114_v40  ;;  %v1115_v43 = vadd.f32 1.0, %v1521_v41 }
 0x48c   : > { %1526 = vrcp.f32 %v1112_v28  ;;  %v1113_v44 = vadd.f32 1.0, %v1523_v42 }
 0x48d   : > { %1528 = vrcp.f32 %v1115_v43 }
 0x48e   : > { %1530 = vrcp.f32 %v1113_v44 }
 0x495   : > { %v1525_v47 = vpop.eup %1524 }
 0x496   : > { %v1527_v57 = vpop.eup %1526  ;;  %v1126_v3 = vmul.f32 %v1525_v47, %v1078_v30 }
 0x497   : > { %v1529_v51 = vpop.eup %1528  ;;  %v1124_v53 = vmul.f32 %v1527_v57, %v1070_v49 }
 0x498   : > { %v1531_v54 = vpop.eup %1530  ;;  %1130 = vst [vmem:[%s349_s24 + $0x10] sm:$0xff] %v1126_v3  ;;  %v1127_v55 = vmul.f32 %v1529_v51, %v1081_v50 }
 0x499   : > { %1128 = vst [vmem:[%s349_s24] sm:$0xff] %v1124_v53  ;;  %v1125_v56 = vmul.f32 %v1531_v54, %v1073_v52 }
 0x49a   : > { %1131 = vst [vmem:[%s349_s24 + $0x18] sm:$0xff] %v1127_v55 }
 0x49b   : > { %1129 = vst [vmem:[%s349_s24 + $0x8] sm:$0xff] %v1125_v56 }
 0x49c   : > { %1545 = shalt.err (!%p1542_p7)
}
 0x49d   : > { %s1546_s19 = scalar_lea.hbm %s2039_s18, 512  ;;  %s1550_s29 = scalar_lea.hbm %s2104_s9, 2048 }
 0x49e   : > { %p1547_p9 = scmp.ne.s32.totalorder %s2039_s18, %s1546_s19  ;;  %p1551_p12 = scmp.lt.u32.totalorder %s2039_s18, %s2104_s9 }
 0x49f   : > { %p1552_p13 = scmp.lt.u32.totalorder %s1550_s29, %s1546_s19  ;;  %p1554_p1 = scmp.lt.u32.totalorder %s1546_s19, %s2039_s18 }
 0x4a0   : > { %p1548_p10 = pnand %p1547_p9, %p1737_p3 }
 0x4a1   : > { %p1553_p0 = por %p1552_p13, %p1551_p12 }
 0x4a2   : > { %p1549_p11 = pneg %p1548_p10 }
 0x4a3   : > { %p1555_p2 = por %p1554_p1, %p1553_p0 }
 0x4a5   : > { %p1556_p4 = pnand %p1555_p2, %p1549_p11 }
 0x4a7   : > { %1559 = shalt.err (!%p1556_p4)
}
 0x4a8   : > { %s1633_s13 = smov 128   ;;  %s1634_s25 = smov 256  }
 0x4a9   : > { %s1635_s15 = smov 8  }
 0x4aa   : > { %1316 = dma.vmem_to_hbm [thread:$0]  (%p1737_p3), %s2041_s14, 512, %s2039_s18, %s2043_s12, %s1633_s13, %s1634_s25, %s1635_s15  }
 0x4ab PF: > { %p1322_p5 = scmp.ge.s32.totalorder %s1626_s16, 2  ;;  %s1162_s21 = sand.u32 1, %s1598_s30  }
 0x4ac   : > { %s1163_s20 = scalar_lea.sflag [#allocation3], %s1162_s21 }
 0x4ad   : > { %p1319_p6 = pnand %p1322_p5, %p1746_p8 }
 0x4af   : > { %1593 = dma.done.wait (!%p1319_p6), %s1163_s20, 512  }
 0x4b0   : > { %1595 = vsyncadd (!%p1319_p6), %s1163_s20, 4294966784  ;;  %s22_s16 = sadd.s32 1, %s1626_s16   ;;  %s2128_s12 = sld [smem:[#allocation5_spill]] }
 0x4b1   : > { %p19_p7 = scmp.ge.s32.totalorder %s22_s16, 6   ;;  %s2129_s13 = sld [smem:[#allocation6_spill]] }
 0x4b2   : > { %s2130_s14 = sld [smem:[#allocation7_spill]]  ;;  %s2131_s15 = sld [smem:[#allocation8_spill]] }
 0x4b3   : > { %s2132_s30 = smov %s1602_s10  ;;  %s2133_s10 = smov %s1606_s11 }
 0x4b4   : > { %s2134_s11 = smov %s1755_s27  ;;  %21 = sbr.rel (!%p19_p7) target bundleno = 5 (0x5), region = 91 }
 0x4bb   :  { %1168 = vsyncpa [#allocation3], 1 }
 0x4bc   :  { %1170 = vsyncpa [#allocation3 + $0x1], 1 }

</bundles_post_ra>
